<compile_context>
chip_gen: v7x
topology: tpu7x:2x2x1
jax: 0.10.0
libtpu: 0.0.40
codegen_flags: <defaults>
</compile_context>

<pallas_src>
import jax
import jax.numpy as jnp
from jax.experimental import pallas as pl
from jax.experimental.pallas import tpu as pltpu

VOCAB = 8192          # must exceed token id 7081
HIDDEN = 32
TOKEN_ID = 7081       # the hard-coded token index from the PyTorch module
TV = 4096             # vocab tile width (VOCAB // TV = 2 pipelined steps)
TGT_TILE = TOKEN_ID // TV   # grid step that holds the target column
TGT_COL = TOKEN_ID % TV     # column of TOKEN_ID inside that tile


def prm_head_kernel(h_ref, w1_ref, b1_ref, wlm_ref, out_ref,
                    h_sc, m_sc, s_sc, t_sc):
    # h_ref:   (Bp, H)   last-position hidden state (f32, batch padded to 8)
    # w1_ref:  (H, H)    small projection ("base model" final layer), f32
    # b1_ref:  (1, H)    f32
    # wlm_ref: (H, TV)   LM-head vocab tile, bf16 (the only DMA that matters)
    # out_ref: (Bp, 1)   probability of TOKEN_ID at the last position
    # scratch: h_sc (Bp,H) bf16; m_sc/s_sc/t_sc (Bp,1) f32
    i = pl.program_id(0)

    @pl.when(i == 0)
    def _init():
        h = jnp.tanh(
            jnp.dot(h_ref[...], w1_ref[...], preferred_element_type=jnp.float32)
            + b1_ref[...]
        )
        h_sc[...] = h.astype(h_sc.dtype)          # cast to bf16 exactly once
        m_sc[...] = jnp.full_like(m_sc, -jnp.inf)
        s_sc[...] = jnp.zeros_like(s_sc)
        t_sc[...] = jnp.zeros_like(t_sc)

    # (Bp, TV) logits for this vocab tile: bf16 x bf16 MXU, f32 accumulation.
    logits = jnp.dot(h_sc[...], wlm_ref[...], preferred_element_type=jnp.float32)

    # Target logit pulled from the SAME bf16 logits tile (consistent with the
    # denominator quantization).  One cheap cross-lane max, only on one step.
    @pl.when(i == TGT_TILE)
    def _grab_target():
        col_ids = jax.lax.broadcasted_iota(jnp.int32, logits.shape, 1)
        t_sc[...] = jnp.max(
            jnp.where(col_ids == TGT_COL, logits, -jnp.inf),
            axis=-1, keepdims=True)

    # Online-softmax running max / sum(exp) over the vocab axis.
    m_new = jnp.maximum(m_sc[...], jnp.max(logits, axis=-1, keepdims=True))
    scale = jnp.exp(m_sc[...] - m_new)
    s_sc[...] = scale * s_sc[...] + jnp.sum(
        jnp.exp(logits - m_new), axis=-1, keepdims=True)
    m_sc[...] = m_new

    @pl.when(i == pl.num_programs(0) - 1)
    def _finalize():
        out_ref[...] = jnp.exp(t_sc[...] - m_sc[...]) * pl.reciprocal(
            s_sc[...], approx=True)


def prm_head_pallas(h_last, w1, b1, wlm_bf16):
    """h_last: (B, H) f32;  wlm_bf16: (H, VOCAB) bf16 (stored bf16 at init)."""
    B = h_last.shape[0]
    B_pad = max(8, ((B + 7) // 8) * 8)              # pad batch to a sublane multiple
    h_pad = jnp.zeros((B_pad, HIDDEN), jnp.float32).at[:B].set(
        h_last.astype(jnp.float32))

    assert VOCAB % TV == 0
    n_tiles = VOCAB // TV

    out = pl.pallas_call(
        prm_head_kernel,
        out_shape=jax.ShapeDtypeStruct((B_pad, 1), jnp.float32),
        grid_spec=pltpu.PrefetchScalarGridSpec(
            num_scalar_prefetch=0,
            grid=(n_tiles,),
            in_specs=[
                pl.BlockSpec((B_pad, HIDDEN), lambda i: (0, 0)),
                pl.BlockSpec((HIDDEN, HIDDEN), lambda i: (0, 0)),
                pl.BlockSpec((1, HIDDEN), lambda i: (0, 0)),
                pl.BlockSpec((HIDDEN, TV), lambda i: (0, i)),   # vocab-tiled LM head
            ],
            out_specs=pl.BlockSpec((B_pad, 1), lambda i: (0, 0)),
            scratch_shapes=[
                pltpu.VMEM((B_pad, HIDDEN), jnp.bfloat16),  # h after tanh (bf16 once)
                pltpu.VMEM((B_pad, 1), jnp.float32),        # running max
                pltpu.VMEM((B_pad, 1), jnp.float32),        # running sum(exp)
                pltpu.VMEM((B_pad, 1), jnp.float32),        # target logit
            ],
        ),
        compiler_params=pltpu.CompilerParams(
            dimension_semantics=("arbitrary",),   # vocab axis is a reduction
        ),
    )(h_pad, w1.astype(jnp.float32), b1.astype(jnp.float32), wlm_bf16)
    return out[:B, 0]


def chatglm_prm_forward(input_ids, attention_mask, params):
    """Synthetic base model (glue) + Pallas head.  Returns (B,) float32."""
    emb, w1, b1, wlm_bf16 = params
    x = emb[input_ids]                                     # (B, S, H) gather (glue)
    mask_f = attention_mask.astype(jnp.float32)            # (B, S)
    denom = jnp.maximum(mask_f.sum(axis=1, keepdims=True), 1.0)
    ctx = (x * mask_f[:, :, None]).sum(axis=1) / denom     # masked mean pool (B, H)
    h_last = x[:, -1, :] + ctx                             # (B, H)
    return prm_head_pallas(h_last, w1, b1, wlm_bf16)


def reference_forward(input_ids, attention_mask, params):
    """Pure-JAX f32 reference mirroring the PyTorch forward exactly (full softmax)."""
    emb, w1, b1, wlm_bf16 = params
    wlm = wlm_bf16.astype(jnp.float32)                     # same stored (bf16) weights
    x = emb[input_ids]
    mask_f = attention_mask.astype(jnp.float32)
    denom = jnp.maximum(mask_f.sum(axis=1, keepdims=True), 1.0)
    ctx = (x * mask_f[:, :, None]).sum(axis=1) / denom
    # apply the same per-position head to every position to build full logits
    h = jnp.tanh(jnp.einsum("bsh,hk->bsk", x + ctx[:, None, :], w1) + b1[0])
    logits = jnp.einsum("bsh,hv->bsv", h, wlm)             # (B, S, V)
    probs = jax.nn.softmax(logits, axis=-1)
    return probs[:, -1, TOKEN_ID]


def init_params(key):
    k_emb, k_w1, k_b1, k_lm = jax.random.split(key, 4)
    emb = jax.random.normal(k_emb, (VOCAB, HIDDEN), jnp.float32) * 0.02
    w1 = jax.random.normal(k_w1, (HIDDEN, HIDDEN), jnp.float32) * (HIDDEN ** -0.5)
    b1 = jax.random.normal(k_b1, (1, HIDDEN), jnp.float32) * 0.01
    # LM head stored in bf16 ONCE here (no per-call cast in the forward path).
    wlm = (jax.random.normal(k_lm, (HIDDEN, VOCAB), jnp.float32)
           * (HIDDEN ** -0.5)).astype(jnp.bfloat16)
    return emb, w1, b1, wlm


if __name__ == "__main__":
    key = jax.random.PRNGKey(0)
    k_par, k_ids = jax.random.split(key)
    params = init_params(k_par)

    B, S = 2, 8
    input_ids = jax.random.randint(k_ids, (B, S), 0, VOCAB, dtype=jnp.int32)
    attention_mask = jnp.array(
        [[1, 1, 1, 1, 1, 1, 0, 0],
         [1, 1, 1, 1, 1, 1, 1, 1]], dtype=jnp.int32)

    out = chatglm_prm_forward(input_ids, attention_mask, params)
    out = jax.block_until_ready(out)

    ref = reference_forward(input_ids, attention_mask, params)
    assert out.shape == (B,)
    # bf16 h / MXU accumulation + approx reciprocal vs f32 full-softmax reference.
    assert jnp.allclose(out, ref, rtol=2e-2, atol=1e-7), (out, ref)

    print("KERNEL_OK")
</pallas_src>

<mosaic_0001>
module attributes {stable_mosaic.version = 11 : i64} {
  func.func @prm_head_kernel(%arg0: i32, %arg1: memref<8x32xf32, #tpu.memory_space<vmem>>, %arg2: memref<32x32xf32, #tpu.memory_space<vmem>>, %arg3: memref<1x32xf32, #tpu.memory_space<vmem>>, %arg4: memref<32x4096xbf16, #tpu.memory_space<vmem>>, %arg5: memref<8x1xf32, #tpu.memory_space<vmem>>, %arg6: memref<8x32xbf16, #tpu.memory_space<vmem>>, %arg7: memref<8x1xf32, #tpu.memory_space<vmem>>, %arg8: memref<8x1xf32, #tpu.memory_space<vmem>>, %arg9: memref<8x1xf32, #tpu.memory_space<vmem>>) attributes {dimension_semantics = [#tpu.dimension_semantics<arbitrary>], iteration_bounds = array<i64: 2>, scalar_prefetch = 0 : i64, scratch_operands = 4 : i64, tpu.core_type = #tpu.core_type<tc>, window_params = [{pipeline_mode = #tpu.pipeline_mode<synchronous>, transform_indices = @transform_0, window_bounds = array<i64: 8, 32>}, {pipeline_mode = #tpu.pipeline_mode<synchronous>, transform_indices = @transform_1, window_bounds = array<i64: 32, 32>}, {pipeline_mode = #tpu.pipeline_mode<synchronous>, transform_indices = @transform_2, window_bounds = array<i64: 1, 32>}, {transform_indices = @transform_3, window_bounds = array<i64: 32, 4096>}, {pipeline_mode = #tpu.pipeline_mode<synchronous>, transform_indices = @transform_4, window_bounds = array<i64: 8, 1>}]} {
    %c0_i32 = arith.constant 0 : i32
    %0 = arith.cmpi eq, %arg0, %c0_i32 : i32
    %1 = arith.extui %0 : i1 to i32
    %c0_i32_0 = arith.constant 0 : i32
    %2 = arith.cmpi ne, %1, %c0_i32_0 : i32
    scf.if %2 {
      %c0_19 = arith.constant 0 : index
      %c0_20 = arith.constant 0 : index
      %29 = vector.load %arg1[%c0_19, %c0_20] : memref<8x32xf32, #tpu.memory_space<vmem>>, vector<8x32xf32>
      %c0_21 = arith.constant 0 : index
      %c0_22 = arith.constant 0 : index
      %30 = vector.load %arg2[%c0_21, %c0_22] : memref<32x32xf32, #tpu.memory_space<vmem>>, vector<32x32xf32>
      %cst_23 = arith.constant dense<0.000000e+00> : vector<8x32xf32>
      %31 = tpu.matmul %29, %30, %cst_23 {dimension_numbers = #tpu.dot_dimension_numbers<[1], [0], [0], [1], [0, 0, 1, 1], [], []>} : vector<8x32xf32>, vector<32x32xf32>, vector<8x32xf32> -> vector<8x32xf32>
      %c0_24 = arith.constant 0 : index
      %c0_25 = arith.constant 0 : index
      %32 = vector.load %arg3[%c0_24, %c0_25] : memref<1x32xf32, #tpu.memory_space<vmem>>, vector<1x32xf32>
      %33 = vector.broadcast %32 : vector<1x32xf32> to vector<8x32xf32>
      %34 = arith.addf %31, %33 : vector<8x32xf32>
      %35 = math.tanh %34 : vector<8x32xf32>
      %36 = arith.truncf %35 : vector<8x32xf32> to vector<8x32xbf16>
      %c0_26 = arith.constant 0 : index
      %c0_27 = arith.constant 0 : index
      %37 = vector.load %arg6[%c0_26, %c0_27] : memref<8x32xbf16, #tpu.memory_space<vmem>>, vector<8x32xbf16>
      tpu.vector_store %arg6[%c0_26, %c0_27], %36 {strides = array<i32>} : memref<8x32xbf16, #tpu.memory_space<vmem>>, vector<8x32xbf16>,
      %cst_28 = arith.constant 0xFF800000 : f32
      %38 = vector.broadcast %cst_28 : f32 to vector<8x1xf32>
      %c0_29 = arith.constant 0 : index
      %c0_30 = arith.constant 0 : index
      %39 = vector.load %arg7[%c0_29, %c0_30] : memref<8x1xf32, #tpu.memory_space<vmem>>, vector<8x1xf32>
      tpu.vector_store %arg7[%c0_29, %c0_30], %38 {strides = array<i32>} : memref<8x1xf32, #tpu.memory_space<vmem>>, vector<8x1xf32>,
      %cst_31 = arith.constant 0.000000e+00 : f32
      %40 = vector.broadcast %cst_31 : f32 to vector<8x1xf32>
      %c0_32 = arith.constant 0 : index
      %c0_33 = arith.constant 0 : index
      %41 = vector.load %arg8[%c0_32, %c0_33] : memref<8x1xf32, #tpu.memory_space<vmem>>, vector<8x1xf32>
      tpu.vector_store %arg8[%c0_32, %c0_33], %40 {strides = array<i32>} : memref<8x1xf32, #tpu.memory_space<vmem>>, vector<8x1xf32>,
      %cst_34 = arith.constant 0.000000e+00 : f32
      %42 = vector.broadcast %cst_34 : f32 to vector<8x1xf32>
      %c0_35 = arith.constant 0 : index
      %c0_36 = arith.constant 0 : index
      %43 = vector.load %arg9[%c0_35, %c0_36] : memref<8x1xf32, #tpu.memory_space<vmem>>, vector<8x1xf32>
      tpu.vector_store %arg9[%c0_35, %c0_36], %42 {strides = array<i32>} : memref<8x1xf32, #tpu.memory_space<vmem>>, vector<8x1xf32>,
    } else {
    }
    %c0 = arith.constant 0 : index
    %c0_1 = arith.constant 0 : index
    %3 = vector.load %arg6[%c0, %c0_1] : memref<8x32xbf16, #tpu.memory_space<vmem>>, vector<8x32xbf16>
    %c0_2 = arith.constant 0 : index
    %c0_3 = arith.constant 0 : index
    %4 = vector.load %arg4[%c0_2, %c0_3] : memref<32x4096xbf16, #tpu.memory_space<vmem>>, vector<32x4096xbf16>
    %cst = arith.constant dense<0.000000e+00> : vector<8x4096xf32>
    %5 = tpu.matmul %3, %4, %cst {dimension_numbers = #tpu.dot_dimension_numbers<[1], [0], [0], [1], [0, 0, 1, 1], [], []>} : vector<8x32xbf16>, vector<32x4096xbf16>, vector<8x4096xf32> -> vector<8x4096xf32>
    %c1_i32 = arith.constant 1 : i32
    %6 = arith.cmpi eq, %arg0, %c1_i32 : i32
    %7 = arith.extui %6 : i1 to i32
    %c0_i32_4 = arith.constant 0 : i32
    %8 = arith.cmpi ne, %7, %c0_i32_4 : i32
    scf.if %8 {
      %29 = tpu.iota {dimensions = array<i32: 1>} : vector<8x4096xi32>
      %c2985_i32 = arith.constant 2985 : i32
      %30 = vector.broadcast %c2985_i32 : i32 to vector<8x4096xi32>
      %31 = arith.cmpi eq, %29, %30 : vector<8x4096xi32>
      %cst_19 = arith.constant 0xFF800000 : f32
      %32 = vector.broadcast %cst_19 : f32 to vector<8x4096xf32>
      %33 = arith.select %31, %5, %32 : vector<8x4096xi1>, vector<8x4096xf32>
      %cst_20 = arith.constant dense<0xFF800000> : vector<8xf32>
      %34 = vector.multi_reduction <maximumf>, %33, %cst_20 [1] : vector<8x4096xf32> to vector<8xf32>
      %35 = vector.shape_cast %34 : vector<8xf32> to vector<8x1xf32>
      %c0_21 = arith.constant 0 : index
      %c0_22 = arith.constant 0 : index
      %36 = vector.load %arg9[%c0_21, %c0_22] : memref<8x1xf32, #tpu.memory_space<vmem>>, vector<8x1xf32>
      tpu.vector_store %arg9[%c0_21, %c0_22], %35 {strides = array<i32>} : memref<8x1xf32, #tpu.memory_space<vmem>>, vector<8x1xf32>,
    } else {
    }
    %c0_5 = arith.constant 0 : index
    %c0_6 = arith.constant 0 : index
    %9 = vector.load %arg7[%c0_5, %c0_6] : memref<8x1xf32, #tpu.memory_space<vmem>>, vector<8x1xf32>
    %cst_7 = arith.constant dense<0xFF800000> : vector<8xf32>
    %10 = vector.multi_reduction <maximumf>, %5, %cst_7 [1] : vector<8x4096xf32> to vector<8xf32>
    %11 = vector.shape_cast %10 : vector<8xf32> to vector<8x1xf32>
    %12 = arith.maximumf %9, %11 : vector<8x1xf32>
    %c0_8 = arith.constant 0 : index
    %c0_9 = arith.constant 0 : index
    %13 = vector.load %arg7[%c0_8, %c0_9] : memref<8x1xf32, #tpu.memory_space<vmem>>, vector<8x1xf32>
    %14 = arith.subf %13, %12 : vector<8x1xf32>
    %15 = math.exp %14 : vector<8x1xf32>
    %c0_10 = arith.constant 0 : index
    %c0_11 = arith.constant 0 : index
    %16 = vector.load %arg8[%c0_10, %c0_11] : memref<8x1xf32, #tpu.memory_space<vmem>>, vector<8x1xf32>
    %17 = arith.mulf %15, %16 : vector<8x1xf32>
    %18 = vector.broadcast %12 : vector<8x1xf32> to vector<8x4096xf32>
    %19 = arith.subf %5, %18 : vector<8x4096xf32>
    %20 = math.exp %19 : vector<8x4096xf32>
    %cst_12 = arith.constant dense<0.000000e+00> : vector<8xf32>
    %21 = vector.multi_reduction <add>, %20, %cst_12 [1] : vector<8x4096xf32> to vector<8xf32>
    %22 = vector.shape_cast %21 : vector<8xf32> to vector<8x1xf32>
    %23 = arith.addf %17, %22 : vector<8x1xf32>
    %c0_13 = arith.constant 0 : index
    %c0_14 = arith.constant 0 : index
    %24 = vector.load %arg8[%c0_13, %c0_14] : memref<8x1xf32, #tpu.memory_space<vmem>>, vector<8x1xf32>
    tpu.vector_store %arg8[%c0_13, %c0_14], %23 {strides = array<i32>} : memref<8x1xf32, #tpu.memory_space<vmem>>, vector<8x1xf32>,
    %c0_15 = arith.constant 0 : index
    %c0_16 = arith.constant 0 : index
    %25 = vector.load %arg7[%c0_15, %c0_16] : memref<8x1xf32, #tpu.memory_space<vmem>>, vector<8x1xf32>
    tpu.vector_store %arg7[%c0_15, %c0_16], %12 {strides = array<i32>} : memref<8x1xf32, #tpu.memory_space<vmem>>, vector<8x1xf32>,
    %c1_i32_17 = arith.constant 1 : i32
    %26 = arith.cmpi eq, %arg0, %c1_i32_17 : i32
    %27 = arith.extui %26 : i1 to i32
    %c0_i32_18 = arith.constant 0 : i32
    %28 = arith.cmpi ne, %27, %c0_i32_18 : i32
    scf.if %28 {
      %c0_19 = arith.constant 0 : index
      %c0_20 = arith.constant 0 : index
      %29 = vector.load %arg9[%c0_19, %c0_20] : memref<8x1xf32, #tpu.memory_space<vmem>>, vector<8x1xf32>
      %c0_21 = arith.constant 0 : index
      %c0_22 = arith.constant 0 : index
      %30 = vector.load %arg7[%c0_21, %c0_22] : memref<8x1xf32, #tpu.memory_space<vmem>>, vector<8x1xf32>
      %31 = arith.subf %29, %30 : vector<8x1xf32>
      %32 = math.exp %31 : vector<8x1xf32>
      %c0_23 = arith.constant 0 : index
      %c0_24 = arith.constant 0 : index
      %33 = vector.load %arg8[%c0_23, %c0_24] : memref<8x1xf32, #tpu.memory_space<vmem>>, vector<8x1xf32>
      %34 = tpu.reciprocal %33 {approx = true} : vector<8x1xf32> -> vector<8x1xf32>
      %35 = arith.mulf %32, %34 : vector<8x1xf32>
      %c0_25 = arith.constant 0 : index
      %c0_26 = arith.constant 0 : index
      %36 = vector.load %arg5[%c0_25, %c0_26] : memref<8x1xf32, #tpu.memory_space<vmem>>, vector<8x1xf32>
      tpu.vector_store %arg5[%c0_25, %c0_26], %35 {strides = array<i32>} : memref<8x1xf32, #tpu.memory_space<vmem>>, vector<8x1xf32>,
    } else {
    }
    return
  }
  func.func @transform_0(%arg0: i32) -> (i32, i32) {
    %c0_i32 = arith.constant 0 : i32
    %c0_i32_0 = arith.constant 0 : i32
    %c0_i32_1 = arith.constant 0 : i32
    return %c0_i32, %c0_i32_0 : i32, i32
  }
  func.func @transform_1(%arg0: i32) -> (i32, i32) {
    %c0_i32 = arith.constant 0 : i32
    %c0_i32_0 = arith.constant 0 : i32
    %c0_i32_1 = arith.constant 0 : i32
    return %c0_i32, %c0_i32_0 : i32, i32
  }
  func.func @transform_2(%arg0: i32) -> (i32, i32) {
    %c0_i32 = arith.constant 0 : i32
    %c0_i32_0 = arith.constant 0 : i32
    %c0_i32_1 = arith.constant 0 : i32
    return %c0_i32, %c0_i32_0 : i32, i32
  }
  func.func @transform_3(%arg0: i32) -> (i32, i32) {
    %c0_i32 = arith.constant 0 : i32
    %c0_i32_0 = arith.constant 0 : i32
    return %c0_i32, %arg0 : i32, i32
  }
  func.func @transform_4(%arg0: i32) -> (i32, i32) {
    %c0_i32 = arith.constant 0 : i32
    %c0_i32_0 = arith.constant 0 : i32
    %c0_i32_1 = arith.constant 0 : i32
    return %c0_i32, %c0_i32_0 : i32, i32
  }
}

</mosaic_0001>

<bundles_post_ra>
// kernel: tpu_custom_call.1
= control target key start
LH: loop header
LB: loop body
LE: loop exit
PB: predicated region body
PF: predicated region fallthrough
CT: control target
= control target key end

     0   :  { %9 = vsyncpa [#allocation7], 0  ;;  %s2682_s0 = inlined_call_operand.hbm [shape: f32[8,32], index: 0, kind: input, shape index: {}]   ;;  %s2683_s1 = inlined_call_operand.hbm [shape: f32[32,32], index: 1, kind: input, shape index: {}]   ;;  %s2684_s2 = inlined_call_operand.vmem [shape: f32[1,32], index: 2, kind: input, shape index: {}]   ;;  %s2685_s3 = inlined_call_operand.hbm [shape: bf16[32,8192], index: 3, kind: input, shape index: {}]   ;;  %s2686_s4 = inlined_call_operand.vmem [shape: f32[8,1], index: 4, kind: output, shape index: {}]  }
   0x1   :  { %10 = vsyncpa [#allocation9], 0  ;;  %s2188_s15 = smov 0   ;;  %s2190_s16 = smov 0  }
   0x2   :  { %s2192_s17 = smov 0   ;;  %s2194_s18 = smov 0  }
   0x3 LB: > { %s2207_s19 = sadd.s32 4294967295, %s2149_s18   ;;  %s2210_s20 = sadd.s32 1, %s2149_s18   ;;  %s2149_s18 = sphi %s2194_s18, %s2707_s18   ;;  %s2145_s17 = sphi %s2192_s17, %s2706_s17   ;;  %s2141_s16 = sphi %s2190_s16, %s2705_s16   ;;  %s2137_s15 = sphi %s2188_s15, %s2704_s15  }
   0x4   : > { %s83_s21 = ssub.s32 %s2149_s18, %s2210_s20  ;;  %s86_s22 = sadd.s32 1, %s2145_s17 }
   0x5   : > { %p84_p0 = scmp.eq.s32.totalorder %s83_s21, 0  ;;  %p93_p1 = scmp.ne.s32.totalorder %s2145_s17, %s2141_s16 }
   0x6   : > { %p94_p2 = scmp.eq.s32.totalorder %s2149_s18, 0  ;;  %p99_p3 = scmp.ne.s32.totalorder %s2141_s16, %s2137_s15 }
   0x7   : > { %s2220_s23 = scalar_select %p84_p0, %s2145_s17, %s86_s22  }
   0x8   : > { %p2222_p4 = por %p94_p2, %p93_p1  ;;  %p2687_p5 = scmp.eq.s32.totalorder %s2207_s19, 0 }
   0x9   : > { %p1758_p6 = scmp.ge.s32.totalorder %s2149_s18, 1  ;;  %p131_p7 = scmp.lt.s32.totalorder %s2149_s18, 3 }
   0xa   : > { %p2231_p8 = por %p2687_p5, %p99_p3  ;;  %s2151_s27 = smov [#allocation6]  }
   0xb   : > { %p2236_p10 = pnand %p1758_p6, %p131_p7  ;;  %s144_s28 = sshll.u32 %s2151_s27, 4  ;;  %s145_s28 = int_to_ptr.vmem [resolvable:$true] %s144_s28 }
   0xc   : > { %s2692_s25 = scalar_select %p2231_p8, 1, 0 }
   0xd   : > { %s2693_s26 = scalar_select %p2236_p10, 1, 0 }
   0xe   : > { %p1889_p11 = pneg %p2236_p10  ;;  %p1902_p12 = scmp.lt.s32.totalorder %s2149_s18, 2 }
   0xf   : > { %s2152_s30 = smov [#allocation8]   ;;  %s2021_s9 = scalar_lea.hbm %s2682_s0, 128 }
  0x10   : > { %p2245_p13 = pnand %p1889_p11, %p2687_p5  ;;  %s154_s5 = sshll.u32 %s2152_s30, 4  ;;  %s2255_s5 = int_to_ptr.vmem [resolvable:$true] %s154_s5 }
  0x11   : > { %p2251_p0 = pnand %p1902_p12, %p2222_p4  ;;  %p2022_p1 = scmp.ne.s32.totalorder %s2682_s0, %s2021_s9 }
  0x12   : > { %p2023_p2 = pneg %p2245_p13  ;;  %p2028_p4 = scmp.lt.u32.totalorder %s2021_s9, %s2682_s0 }
  0x13   : > { %s2695_s6 = scalar_select %p2251_p0, 1, 0 }
  0x14   : > { %p2024_p3 = pnand %p2023_p2, %p2022_p1 }
  0x16   : > { %p2025_p6 = pneg %p2024_p3 }
  0x18   : > { %p2030_p7 = pnand %p2028_p4, %p2025_p6 }
  0x1a   : > { %2033 = shalt.err (!%p2030_p7)
}
  0x1b   : > { %s2034_s14 = scalar_lea.vmem %s145_s28, 128  ;;  %p2042_p5 = scmp.lt.s32.totalorder %s145_s28, %s145_s28 }
  0x1c   : > { %p2035_p11 = scmp.ne.s32.totalorder %s145_s28, %s2034_s14  ;;  %p2043_p8 = scmp.lt.s32.totalorder %s2034_s14, %s2034_s14 }
  0x1e   : > { %p2037_p12 = pnand %p2035_p11, %p2023_p2  ;;  %p2044_p10 = por %p2043_p8, %p2042_p5 }
  0x20   : > { %p2038_p9 = pneg %p2037_p12 }
  0x22   : > { %p2045_p0 = pnand %p2044_p10, %p2038_p9 }
  0x24   : > { %2048 = shalt.err (!%p2045_p0)
}
  0x25   : > { %1892 = dma.hbm_to_vmem [thread:$0]  (!%p2245_p13), %s2682_s0, 128, %s145_s28, [#allocation7]  }
  0x26   : > { %s2049_s27 = scalar_lea.hbm %s2683_s1, 512 }
  0x27   : > { %p2050_p1 = scmp.ne.s32.totalorder %s2683_s1, %s2049_s27  ;;  %p2056_p9 = scmp.lt.u32.totalorder %s2049_s27, %s2683_s1 }
  0x29   : > { %p2052_p5 = pnand %p2050_p1, %p2023_p2 }
  0x2b   : > { %p2053_p8 = pneg %p2052_p5 }
  0x2d   : > { %p2058_p10 = pnand %p2056_p9, %p2053_p8 }
  0x2f   : > { %2061 = shalt.err (!%p2058_p10)
}
  0x30   : > { %s2062_s28 = scalar_lea.vmem %s2255_s5, 512  ;;  %p2070_p4 = scmp.lt.s32.totalorder %s2255_s5, %s2255_s5 }
  0x31   : > { %p2063_p0 = scmp.ne.s32.totalorder %s2255_s5, %s2062_s28  ;;  %p2071_p7 = scmp.lt.s32.totalorder %s2062_s28, %s2062_s28 }
  0x33   : > { %p2065_p3 = pnand %p2063_p0, %p2023_p2  ;;  %p2072_p11 = por %p2071_p7, %p2070_p4 }
  0x35   : > { %p2066_p6 = pneg %p2065_p3 }
  0x37   : > { %p2073_p12 = pnand %p2072_p11, %p2066_p6 }
  0x39   : > { %2076 = shalt.err (!%p2073_p12)
}
  0x3a   : > { %s2153_s10 = smov 128   ;;  %s2154_s11 = smov 8  }
  0x3b   : > { %1895 = dma.hbm_to_vmem [thread:$0]  (!%p2245_p13), %s2683_s1, 512, %s2255_s5, [#allocation9], %s2153_s10, %s2153_s10, %s2154_s11  }
  0x3c   : > { %s171_s14 = sand.u32 1, %s2149_s18   ;;  %s173_s15 = sand.u32 1, %s2145_s17  }
  0x3d   : > { %s1762_s21 = sshll.u32 %s173_s15, 9  ;;  %s1856_s22 = sshll.u32 %s2149_s18, 11 }
  0x3e   : > { %s2312_s30 = scalar_lea.hbm %s2685_s3, %s1856_s22  ;;  %s175_s29 = scalar_lea.vmem [#allocation10], %s1762_s21 }
  0x3f   : > { %s182_s7 = sshll.u32 %s175_s29, 4  ;;  %s2316_s8 = scalar_lea.sflag [#allocation7], %s171_s14  ;;  %s2314_s7 = int_to_ptr.vmem [resolvable:$true] %s182_s7 }
  0x40   : > { %s2077_s5 = scalar_lea.hbm %s2312_s30, 8192  ;;  %p2696_p2 = scmp.ne.s32.totalorder %s2695_s6, 0 }
  0x41   : > { %p2078_p13 = scmp.ne.s32.totalorder %s2312_s30, %s2077_s5  ;;  %s2082_s28 = scalar_lea.hbm %s2685_s3, 16384 }
  0x42   : > { %p2079_p1 = pneg %p2696_p2  ;;  %p2083_p9 = scmp.lt.u32.totalorder %s2312_s30, %s2685_s3 }
  0x43   : > { %p2084_p10 = scmp.lt.u32.totalorder %s2082_s28, %s2077_s5  ;;  %p2086_p3 = scmp.lt.u32.totalorder %s2077_s5, %s2312_s30 }
  0x44   : > { %p2080_p5 = pnand %p2079_p1, %p2078_p13 }
  0x45   : > { %p2085_p0 = por %p2084_p10, %p2083_p9 }
  0x46   : > { %p2081_p8 = pneg %p2080_p5 }
  0x47   : > { %p2087_p6 = por %p2086_p3, %p2085_p0 }
  0x49   : > { %p2088_p4 = pnand %p2087_p6, %p2081_p8 }
  0x4b   : > { %2091 = shalt.err (!%p2088_p4)
}
  0x4c   : > { %s2092_s13 = scalar_lea.vmem %s2314_s7, 8192  ;;  %s2155_s14 = smov [#allocation10]  }
  0x4d   : > { %p2093_p7 = scmp.ne.s32.totalorder %s2314_s7, %s2092_s13  ;;  %s2097_s15 = sshll.u32 %s2155_s14, 4  ;;  %s2098_s15 = int_to_ptr.vmem [resolvable:$false] %s2097_s15 }
  0x4e   : > { %s2099_s21 = scalar_lea.vmem %s2098_s15, 16384  ;;  %p2100_p13 = scmp.lt.s32.totalorder %s2314_s7, %s2098_s15 }
  0x4f   : > { %p2095_p11 = pnand %p2093_p7, %p2079_p1  ;;  %p2101_p5 = scmp.lt.s32.totalorder %s2099_s21, %s2092_s13 }
  0x51   : > { %p2096_p12 = pneg %p2095_p11  ;;  %p2102_p9 = por %p2101_p5, %p2100_p13 }
  0x53   : > { %p2103_p10 = pnand %p2102_p9, %p2096_p12 }
  0x55   : > { %2106 = shalt.err (!%p2103_p10)
}
  0x56   : > { %s2156_s22 = smov 4096   ;;  %s2157_s24 = smov 2048  }
  0x57   : > { %1899 = dma.hbm_to_vmem [thread:$0]  (!%p2696_p2), %s2312_s30, 8192, %s2314_s7, %s2316_s8, %s2156_s22, %s2157_s24, %s2153_s10  }
  0x58   : > { %p2697_p1 = scmp.ne.s32.totalorder %s2693_s26, 0 }
  0x59   : > { %p2698_p8 = scmp.eq.s32.totalorder (!%p2697_p1), %s2207_s19, 0 }
  0x5a   : > { %194 = sbr.rel (%p2697_p1) target bundleno = 1290 (0x50a), region = 36 }
  0x61   : > { %2124 = dma.done.wait (%p2698_p8), [#allocation7], 128   ;;  %p2699_p0 = pmov %p2698_p8 }
  0x63   : > { %2126 = vsyncadd (%p2699_p0), [#allocation7], 4294967168  ;;  %p2700_p3 = pmov %p2699_p0 }
  0x64   : > { %p2701_p6 = pmov %p2699_p0 }
  0x65   : > { %2128 = dma.done.wait (%p2700_p3), [#allocation9], 512  }
  0x66   : > { %2130 = vsyncadd (%p2701_p6), [#allocation9], 4294966784  ;;  %s204_s6 = sand.u32 1, %s2207_s19   ;;  %s206_s10 = sand.u32 1, %s2141_s16  }
  0x67   : > { %s1768_s27 = sshll.u32 %s206_s10, 9  ;;  %s205_s26 = scalar_lea.sflag [#allocation7], %s204_s6 }
  0x68   : > { %s2357_s30 = scalar_lea.vmem [#allocation10], %s1768_s27  ;;  %p2702_p2 = scmp.ne.s32.totalorder %s2692_s25, 0 }
  0x6a   : > { %2132 = dma.done.wait (%p2702_p2), %s205_s26, 8192  }
  0x6b   : > { %2134 = vsyncadd (%p2702_p2), %s205_s26, 4294959104  ;;  %p2703_p4 = scmp.ne.s32.totalorder %s2207_s19, 0 }
  0x6c   : > { %v235_v0 = vld [vmem:[#allocation8] sm:$0xff] (!%p2703_p4)  ;;  %v236_v1 = vld [vmem:[#allocation8 + $0x8] sm:$0xff] (!%p2703_p4)  ;;  %v237_v2 = vld [vmem:[#allocation8 + $0x10] sm:$0xff] (!%p2703_p4)  ;;  %v2158_v3 = vmov (!%p2703_p4), 0.0|0.0   ;;  %vm2159_vm0 = vmmov (!%p2703_p4), 0   ;;  %v2160_v6 = vmov (!%p2703_p4), 0.0  }
  0x6d   : > { %233 = sbr.rel (%p2703_p4) target bundleno = 346 (0x15a), region = 52  ;;  %1873 = vmatprep.subr.bf16.mxu0 (!%p2703_p4), %v2158_v3  ;;  %v1874_v4 = vpack.c.bf16 (!%p2703_p4), %v236_v1, %v235_v0  ;;  %v238_v5 = vld [vmem:[#allocation8 + $0x18] sm:$0xff] (!%p2703_p4)  ;;  %1870 = vmatprep.mubr.msk.f32.mxu0 (!%p2703_p4), %vm2159_vm0, %v2160_v6  ;;  %vm324_vm1 = vcmask (!%p2703_p4), 7168   ;;  %v2161_v7 = vmov (!%p2703_p4), -inf   ;;  %vm246_vm2 = vcmask (!%p2703_p4), 261120  }
  0x6e   : > { %325 = vst.msk [vmem:[#allocation3] sm:$0xff] (!%p2703_p4), %vm324_vm1, %v2161_v7  ;;  %326 = vst.msk [vmem:[#allocation4] sm:$0xff] (!%p2703_p4), %vm324_vm1, %v2160_v6  ;;  %v1877_v8 = vpack.c.bf16 (!%p2703_p4), %v238_v5, %v237_v2  ;;  %v234_v9 = vld [vmem:[#allocation6] sm:$0xff] (!%p2703_p4)  ;;  %v1770_v10 = vld [vmem:[%s2684_s2] ss:$0 sm:$0xff] (!%p2703_p4)  ;;  %vm322_vm3 = vcmask (!%p2703_p4), 257024  }
  0x6f   : > { %327 = vst.msk [vmem:[#allocation5] sm:$0xff] (!%p2703_p4), %vm324_vm1, %v2160_v6  ;;  %1875 = vmatpush3.bf16.msra.mxu0 (!%p2703_p4), %v1874_v4 }
  0x70   : > { %1876 = vmatprep.subr.bf16.mxu0 (!%p2703_p4), %v2158_v3 }
  0x73   : > { %1878 = vmatpush3.bf16.msra.mxu0 (!%p2703_p4), %v1877_v8 }
  0x76   : > { %1871 = vmatmul.mubr.msk.f32.vlgmr.msra.gmra.mrb[0].mxu0 %vm246_vm2, %v234_v9 }
 0x149   : > { %v316_v11 = vpop.f32.mrb[0].mxu0 }
 0x14a   : > { %v317_v12 = vadd.f32 %v1770_v10, %v316_v11  ;;  %v1872_v13 = vpop.f32.mrb[1].mxu0 }
 0x14c   : > { %1948 = vtanh.f32 %v317_v12 }
 0x156   : > { %v1949_v14 = vpop.eup %1948 }
 0x157   : > { %v321_v15 = vpack.c.bf16 %v1949_v14, %v1949_v14 }
 0x159   : > { %323 = vst.msk [vmem:[#allocation2] sm:$0xf] %vm322_vm3, %v321_v15 }
 0x15a PF: > { %v329_v16 = vld [vmem:[%s2357_s30] sm:$0xff]  ;;  %v330_v18 = vld [vmem:[%s2357_s30 + $0x8] sm:$0xff]  ;;  %v2162_v24 = vmov 0   ;;  %v331_v31 = vld [vmem:[%s2357_s30 + $0x10] sm:$0xff]  ;;  %vm713_vm4 = vcmask 261120   ;;  %p1852_p7 = scmp.ne.s32.totalorder %s2207_s19, 1 }
 0x15b   : > { %v345_v17 = vld [vmem:[%s2357_s30 + $0x80] sm:$0xff]  ;;  %v346_v20 = vld [vmem:[%s2357_s30 + $0x88] sm:$0xff]  ;;  %749 = vmatprep.mubr.bf16.mxu0 %v2162_v24  ;;  %790 = vmatprep.mubr.bf16.mxu1 %v2162_v24  ;;  %v347_v32 = vld [vmem:[%s2357_s30 + $0x90] sm:$0xff]  ;;  %vm1507_vm6 = vcmask (!%p1852_p7), 7168  }
 0x15c   : > { %v1773_v19 = vcombine.high %v329_v16, %v345_v17  ;;  %v1772_v21 = vcombine.low %v329_v16, %v345_v17  ;;  %v361_v22 = vld [vmem:[%s2357_s30 + $0x100] sm:$0xff]  ;;  %v1775_v25 = vcombine.high %v330_v18, %v346_v20  ;;  %v1774_v26 = vcombine.low %v330_v18, %v346_v20  ;;  %v362_v28 = vld [vmem:[%s2357_s30 + $0x108] sm:$0xff]  ;;  %v332_v33 = vld [vmem:[%s2357_s30 + $0x18] sm:$0xff] }
 0x15d   : > { %v377_v23 = vld [vmem:[%s2357_s30 + $0x180] sm:$0xff]  ;;  %v378_v29 = vld [vmem:[%s2357_s30 + $0x188] sm:$0xff]  ;;  %v348_v35 = vld [vmem:[%s2357_s30 + $0x98] sm:$0xff]  ;;  %v1777_v37 = vcombine.high %v331_v31, %v347_v32  ;;  %v1776_v44 = vcombine.low %v331_v31, %v347_v32 }
 0x15e   : > { %v1805_v27 = vcombine.high %v361_v22, %v377_v23  ;;  %717 = vmatprep.subr.bf16.mxu0 %v1773_v19  ;;  %v1807_v30 = vcombine.high %v362_v28, %v378_v29  ;;  %758 = vmatprep.subr.bf16.mxu1 %v1775_v25  ;;  %v1804_v34 = vcombine.low %v361_v22, %v377_v23  ;;  %v363_v39 = vld [vmem:[%s2357_s30 + $0x110] sm:$0xff]  ;;  %v364_v41 = vld [vmem:[%s2357_s30 + $0x118] sm:$0xff]  ;;  %v333_v48 = vld [vmem:[%s2357_s30 + $0x20] sm:$0xff] }
 0x15f   : > { %718 = vmatpush1.bf16.msra.mxu0 %v1772_v21  ;;  %759 = vmatpush1.bf16.msra.mxu1 %v1774_v26  ;;  %v1806_v36 = vcombine.low %v362_v28, %v378_v29  ;;  %v1779_v38 = vcombine.high %v332_v33, %v348_v35  ;;  %v379_v40 = vld [vmem:[%s2357_s30 + $0x190] sm:$0xff]  ;;  %v380_v42 = vld [vmem:[%s2357_s30 + $0x198] sm:$0xff]  ;;  %v1778_v45 = vcombine.low %v332_v33, %v348_v35  ;;  %v349_v49 = vld [vmem:[%s2357_s30 + $0xa0] sm:$0xff] }
 0x160   : > { %719 = vmatprep.subr.bf16.mxu0 %v1805_v27  ;;  %760 = vmatprep.subr.bf16.mxu1 %v1807_v30  ;;  %v2386_v43 = vld [vmem:[#allocation2] sm:$0xf]  ;;  %v1809_v46 = vcombine.high %v363_v39, %v379_v40  ;;  %v1811_v47 = vcombine.high %v364_v41, %v380_v42  ;;  %v334_v50 = vld [vmem:[%s2357_s30 + $0x28] sm:$0xff]  ;;  %v1808_v52 = vcombine.low %v363_v39, %v379_v40  ;;  %v365_v56 = vld [vmem:[%s2357_s30 + $0x120] sm:$0xff] }
 0x161   : > { %v350_v51 = vld [vmem:[%s2357_s30 + $0xa8] sm:$0xff]  ;;  %v1810_v53 = vcombine.low %v364_v41, %v380_v42  ;;  %v1781_v54 = vcombine.high %v333_v48, %v349_v49  ;;  %v381_v57 = vld [vmem:[%s2357_s30 + $0x1a0] sm:$0xff]  ;;  %v1780_v60 = vcombine.low %v333_v48, %v349_v49  ;;  %v335_v0 = vld [vmem:[%s2357_s30 + $0x30] sm:$0xff] }
 0x162   : > { %v1783_v55 = vcombine.high %v334_v50, %v350_v51  ;;  %v366_v58 = vld [vmem:[%s2357_s30 + $0x128] sm:$0xff]  ;;  %v1782_v61 = vcombine.low %v334_v50, %v350_v51  ;;  %v1813_v62 = vcombine.high %v365_v56, %v381_v57  ;;  %v351_v1 = vld [vmem:[%s2357_s30 + $0xb0] sm:$0xff]  ;;  %v336_v2 = vld [vmem:[%s2357_s30 + $0x38] sm:$0xff]  ;;  %v1812_v4 = vcombine.low %v365_v56, %v381_v57 }
 0x163   : > { %720 = vmatpush1.bf16.msra.mxu0 %v1804_v34  ;;  %761 = vmatpush1.bf16.msra.mxu1 %v1806_v36  ;;  %v382_v59 = vld [vmem:[%s2357_s30 + $0x1a8] sm:$0xff]  ;;  %v352_v3 = vld [vmem:[%s2357_s30 + $0xb8] sm:$0xff]  ;;  %v1785_v6 = vcombine.high %v335_v0, %v351_v1  ;;  %v367_v8 = vld [vmem:[%s2357_s30 + $0x130] sm:$0xff]  ;;  %v1784_v12 = vcombine.low %v335_v0, %v351_v1 }
 0x164   : > { %799 = vmatprep.subr.bf16.mxu0 %v1777_v37  ;;  %840 = vmatprep.subr.bf16.mxu1 %v1779_v38  ;;  %v1815_v63 = vcombine.high %v366_v58, %v382_v59  ;;  %v1814_v5 = vcombine.low %v366_v58, %v382_v59  ;;  %v1787_v7 = vcombine.high %v336_v2, %v352_v3  ;;  %v383_v9 = vld [vmem:[%s2357_s30 + $0x1b0] sm:$0xff]  ;;  %v368_v10 = vld [vmem:[%s2357_s30 + $0x138] sm:$0xff]  ;;  %v337_v16 = vld [vmem:[%s2357_s30 + $0x40] sm:$0xff] }
 0x165   : > { %v384_v11 = vld [vmem:[%s2357_s30 + $0x1b8] sm:$0xff]  ;;  %v1786_v13 = vcombine.low %v336_v2, %v352_v3  ;;  %v1817_v14 = vcombine.high %v367_v8, %v383_v9  ;;  %v353_v17 = vld [vmem:[%s2357_s30 + $0xc0] sm:$0xff]  ;;  %v338_v18 = vld [vmem:[%s2357_s30 + $0x48] sm:$0xff]  ;;  %v1816_v20 = vcombine.low %v367_v8, %v383_v9 }
 0x166   : > { %1836 = vmatmul.mubr.msk.bf16.vlgmr.msra.gmra.mrb[0].mxu0 %vm713_vm4, %v2386_v43  ;;  %1837 = vmatmul.mubr.msk.bf16.vlgmr.msra.gmra.mrb[0].mxu1 %vm713_vm4, %v2386_v43  ;;  %v1819_v15 = vcombine.high %v368_v10, %v384_v11  ;;  %v354_v19 = vld [vmem:[%s2357_s30 + $0xc8] sm:$0xff]  ;;  %v1818_v21 = vcombine.low %v368_v10, %v384_v11  ;;  %v1789_v22 = vcombine.high %v337_v16, %v353_v17  ;;  %v369_v25 = vld [vmem:[%s2357_s30 + $0x140] sm:$0xff]  ;;  %v339_v33 = vld [vmem:[%s2357_s30 + $0x50] sm:$0xff] }
 0x167   : > { %800 = vmatpush1.bf16.msra.mxu0 %v1776_v44  ;;  %841 = vmatpush1.bf16.msra.mxu1 %v1778_v45  ;;  %v1791_v23 = vcombine.high %v338_v18, %v354_v19  ;;  %v385_v26 = vld [vmem:[%s2357_s30 + $0x1c0] sm:$0xff]  ;;  %v370_v27 = vld [vmem:[%s2357_s30 + $0x148] sm:$0xff]  ;;  %v1788_v29 = vcombine.low %v337_v16, %v353_v17  ;;  %v1790_v30 = vcombine.low %v338_v18, %v354_v19  ;;  %v355_v34 = vld [vmem:[%s2357_s30 + $0xd0] sm:$0xff] }
 0x168   : > { %801 = vmatprep.subr.bf16.mxu0 %v1809_v46  ;;  %842 = vmatprep.subr.bf16.mxu1 %v1811_v47  ;;  %v386_v28 = vld [vmem:[%s2357_s30 + $0x1c8] sm:$0xff]  ;;  %v1821_v31 = vcombine.high %v369_v25, %v385_v26  ;;  %v340_v35 = vld [vmem:[%s2357_s30 + $0x58] sm:$0xff]  ;;  %v1820_v37 = vcombine.low %v369_v25, %v385_v26  ;;  %v1793_v39 = vcombine.high %v339_v33, %v355_v34  ;;  %v371_v41 = vld [vmem:[%s2357_s30 + $0x150] sm:$0xff] }
 0x169   : > { %831 = vmatprep.mubr.bf16.mxu0 %v2162_v24  ;;  %872 = vmatprep.mubr.bf16.mxu1 %v2162_v24  ;;  %v1823_v32 = vcombine.high %v370_v27, %v386_v28  ;;  %v356_v36 = vld [vmem:[%s2357_s30 + $0xd8] sm:$0xff]  ;;  %v1822_v38 = vcombine.low %v370_v27, %v386_v28  ;;  %v387_v42 = vld [vmem:[%s2357_s30 + $0x1d0] sm:$0xff]  ;;  %v1792_v46 = vcombine.low %v339_v33, %v355_v34  ;;  %v341_v50 = vld [vmem:[%s2357_s30 + $0x60] sm:$0xff] }
 0x16a   : > { %v1795_v40 = vcombine.high %v340_v35, %v356_v36  ;;  %v372_v44 = vld [vmem:[%s2357_s30 + $0x158] sm:$0xff]  ;;  %v1794_v47 = vcombine.low %v340_v35, %v356_v36  ;;  %v1825_v48 = vcombine.high %v371_v41, %v387_v42  ;;  %v357_v51 = vld [vmem:[%s2357_s30 + $0xe0] sm:$0xff]  ;;  %v343_v2 = vld [vmem:[%s2357_s30 + $0x70] sm:$0xff] }
 0x16b   : > { %802 = vmatpush1.bf16.msra.mxu0 %v1808_v52  ;;  %843 = vmatpush1.bf16.msra.mxu1 %v1810_v53  ;;  %v388_v45 = vld [vmem:[%s2357_s30 + $0x1d8] sm:$0xff]  ;;  %v342_v52 = vld [vmem:[%s2357_s30 + $0x68] sm:$0xff]  ;;  %v1797_v56 = vcombine.high %v341_v50, %v357_v51  ;;  %v373_v58 = vld [vmem:[%s2357_s30 + $0x160] sm:$0xff] }
 0x16c   : > { %881 = vmatprep.subr.bf16.mxu0 %v1781_v54  ;;  %922 = vmatprep.subr.bf16.mxu1 %v1783_v55  ;;  %v1827_v49 = vcombine.high %v372_v44, %v388_v45  ;;  %v358_v53 = vld [vmem:[%s2357_s30 + $0xe8] sm:$0xff]  ;;  %v1824_v54 = vcombine.low %v371_v41, %v387_v42  ;;  %v1826_v55 = vcombine.low %v372_v44, %v388_v45  ;;  %v389_v59 = vld [vmem:[%s2357_s30 + $0x1e0] sm:$0xff]  ;;  %v359_v3 = vld [vmem:[%s2357_s30 + $0xf0] sm:$0xff] }
 0x16d   : > { %v1799_v57 = vcombine.high %v342_v52, %v358_v53  ;;  %v1829_v0 = vcombine.high %v373_v58, %v389_v59  ;;  %v1801_v8 = vcombine.high %v343_v2, %v359_v3  ;;  %v375_v10 = vld [vmem:[%s2357_s30 + $0x170] sm:$0xff] }
 0x16e   : > { %1838 = vmatmul.mubr.msk.bf16.vlgmr.msra.gmra.mrb[4].mxu0 %vm713_vm4, %v2386_v43  ;;  %1839 = vmatmul.mubr.msk.bf16.vlgmr.msra.gmra.mrb[4].mxu1 %vm713_vm4, %v2386_v43  ;;  %v391_v11 = vld [vmem:[%s2357_s30 + $0x1f0] sm:$0xff] }
 0x16f   : > { %882 = vmatpush1.bf16.msra.mxu0 %v1780_v60  ;;  %923 = vmatpush1.bf16.msra.mxu1 %v1782_v61  ;;  %v374_v60 = vld [vmem:[%s2357_s30 + $0x168] sm:$0xff]  ;;  %v1833_v16 = vcombine.high %v375_v10, %v391_v11  ;;  %v1832_v18 = vcombine.low %v375_v10, %v391_v11 }
 0x170   : > { %883 = vmatprep.subr.bf16.mxu0 %v1813_v62  ;;  %924 = vmatprep.subr.bf16.mxu1 %v1815_v63  ;;  %v390_v61 = vld [vmem:[%s2357_s30 + $0x1e8] sm:$0xff]  ;;  %v1796_v62 = vcombine.low %v341_v50, %v357_v51  ;;  %v1798_v63 = vcombine.low %v342_v52, %v358_v53 }
 0x171   : > { %913 = vmatprep.mubr.bf16.mxu0 %v2162_v24  ;;  %954 = vmatprep.mubr.bf16.mxu1 %v2162_v24  ;;  %v1831_v1 = vcombine.high %v374_v60, %v390_v61 }
 0x173   : > { %884 = vmatpush1.bf16.msra.mxu0 %v1812_v4  ;;  %925 = vmatpush1.bf16.msra.mxu1 %v1814_v5  ;;  %v344_v4 = vld [vmem:[%s2357_s30 + $0x78] sm:$0xff] }
 0x174   : > { %963 = vmatprep.subr.bf16.mxu0 %v1785_v6  ;;  %1004 = vmatprep.subr.bf16.mxu1 %v1787_v7  ;;  %v360_v5 = vld [vmem:[%s2357_s30 + $0xf8] sm:$0xff]  ;;  %v1828_v6 = vcombine.low %v373_v58, %v389_v59  ;;  %v1830_v7 = vcombine.low %v374_v60, %v390_v61 }
 0x175   : > { %v1803_v9 = vcombine.high %v344_v4, %v360_v5 }
 0x176   : > { %1840 = vmatmul.mubr.msk.bf16.vlgmr.msra.gmra.mrb[8].mxu0 %vm713_vm4, %v2386_v43  ;;  %1841 = vmatmul.mubr.msk.bf16.vlgmr.msra.gmra.mrb[8].mxu1 %vm713_vm4, %v2386_v43 }
 0x177   : > { %964 = vmatpush1.bf16.msra.mxu0 %v1784_v12  ;;  %1005 = vmatpush1.bf16.msra.mxu1 %v1786_v13  ;;  %v376_v12 = vld [vmem:[%s2357_s30 + $0x178] sm:$0xff] }
 0x178   : > { %965 = vmatprep.subr.bf16.mxu0 %v1817_v14  ;;  %1006 = vmatprep.subr.bf16.mxu1 %v1819_v15  ;;  %v392_v13 = vld [vmem:[%s2357_s30 + $0x1f8] sm:$0xff]  ;;  %v1800_v14 = vcombine.low %v343_v2, %v359_v3  ;;  %v1802_v15 = vcombine.low %v344_v4, %v360_v5 }
 0x179   : > { %995 = vmatprep.mubr.bf16.mxu0 %v2162_v24  ;;  %1036 = vmatprep.mubr.bf16.mxu1 %v2162_v24  ;;  %v1835_v17 = vcombine.high %v376_v12, %v392_v13  ;;  %v1834_v19 = vcombine.low %v376_v12, %v392_v13 }
 0x17b   : > { %966 = vmatpush1.bf16.msra.mxu0 %v1816_v20  ;;  %1007 = vmatpush1.bf16.msra.mxu1 %v1818_v21 }
 0x17c   : > { %1045 = vmatprep.subr.bf16.mxu0 %v1789_v22  ;;  %1086 = vmatprep.subr.bf16.mxu1 %v1791_v23 }
 0x17e   : > { %1842 = vmatmul.mubr.msk.bf16.vlgmr.msra.gmra.mrb[12].mxu0 %vm713_vm4, %v2386_v43  ;;  %1843 = vmatmul.mubr.msk.bf16.vlgmr.msra.gmra.mrb[12].mxu1 %vm713_vm4, %v2386_v43 }
 0x17f   : > { %1046 = vmatpush1.bf16.msra.mxu0 %v1788_v29  ;;  %1087 = vmatpush1.bf16.msra.mxu1 %v1790_v30 }
 0x180   : > { %1047 = vmatprep.subr.bf16.mxu0 %v1821_v31  ;;  %1088 = vmatprep.subr.bf16.mxu1 %v1823_v32 }
 0x181   : > { %1077 = vmatprep.mubr.bf16.mxu0 %v2162_v24  ;;  %1118 = vmatprep.mubr.bf16.mxu1 %v2162_v24 }
 0x183   : > { %1048 = vmatpush1.bf16.msra.mxu0 %v1820_v37  ;;  %1089 = vmatpush1.bf16.msra.mxu1 %v1822_v38 }
 0x184   : > { %1127 = vmatprep.subr.bf16.mxu0 %v1793_v39  ;;  %1168 = vmatprep.subr.bf16.mxu1 %v1795_v40 }
 0x186   : > { %1844 = vmatmul.mubr.msk.bf16.vlgmr.msra.gmra.mrb[16].mxu0 %vm713_vm4, %v2386_v43  ;;  %1845 = vmatmul.mubr.msk.bf16.vlgmr.msra.gmra.mrb[16].mxu1 %vm713_vm4, %v2386_v43 }
 0x187   : > { %1128 = vmatpush1.bf16.msra.mxu0 %v1792_v46  ;;  %1169 = vmatpush1.bf16.msra.mxu1 %v1794_v47 }
 0x188   : > { %1129 = vmatprep.subr.bf16.mxu0 %v1825_v48  ;;  %1170 = vmatprep.subr.bf16.mxu1 %v1827_v49 }
 0x189   : > { %1159 = vmatprep.mubr.bf16.mxu0 %v2162_v24  ;;  %1200 = vmatprep.mubr.bf16.mxu1 %v2162_v24 }
 0x18b   : > { %1130 = vmatpush1.bf16.msra.mxu0 %v1824_v54  ;;  %1171 = vmatpush1.bf16.msra.mxu1 %v1826_v55 }
 0x18c   : > { %1209 = vmatprep.subr.bf16.mxu0 %v1797_v56  ;;  %1250 = vmatprep.subr.bf16.mxu1 %v1799_v57 }
 0x18e   : > { %1846 = vmatmul.mubr.msk.bf16.vlgmr.msra.gmra.mrb[20].mxu0 %vm713_vm4, %v2386_v43  ;;  %1847 = vmatmul.mubr.msk.bf16.vlgmr.msra.gmra.mrb[20].mxu1 %vm713_vm4, %v2386_v43 }
 0x18f   : > { %1210 = vmatpush1.bf16.msra.mxu0 %v1796_v62  ;;  %1251 = vmatpush1.bf16.msra.mxu1 %v1798_v63 }
 0x190   : > { %1211 = vmatprep.subr.bf16.mxu0 %v1829_v0  ;;  %1252 = vmatprep.subr.bf16.mxu1 %v1831_v1 }
 0x191   : > { %1241 = vmatprep.mubr.bf16.mxu0 %v2162_v24  ;;  %1282 = vmatprep.mubr.bf16.mxu1 %v2162_v24 }
 0x193   : > { %1212 = vmatpush1.bf16.msra.mxu0 %v1828_v6  ;;  %1253 = vmatpush1.bf16.msra.mxu1 %v1830_v7 }
 0x194   : > { %1291 = vmatprep.subr.bf16.mxu0 %v1801_v8  ;;  %1332 = vmatprep.subr.bf16.mxu1 %v1803_v9 }
 0x196   : > { %1848 = vmatmul.mubr.msk.bf16.vlgmr.msra.gmra.mrb[24].mxu0 %vm713_vm4, %v2386_v43  ;;  %1849 = vmatmul.mubr.msk.bf16.vlgmr.msra.gmra.mrb[24].mxu1 %vm713_vm4, %v2386_v43 }
 0x197   : > { %1292 = vmatpush1.bf16.msra.mxu0 %v1800_v14  ;;  %1333 = vmatpush1.bf16.msra.mxu1 %v1802_v15 }
 0x198   : > { %1293 = vmatprep.subr.bf16.mxu0 %v1833_v16  ;;  %1334 = vmatprep.subr.bf16.mxu1 %v1835_v17 }
 0x199   : > { %1323 = vmatprep.mubr.bf16.mxu0 %v2162_v24  ;;  %1364 = vmatprep.mubr.bf16.mxu1 %v2162_v24 }
 0x19b   : > { %1294 = vmatpush1.bf16.msra.mxu0 %v1832_v18  ;;  %1335 = vmatpush1.bf16.msra.mxu1 %v1834_v19 }
 0x19e   : > { %1850 = vmatmul.mubr.msk.bf16.vlgmr.msra.gmra.mrb[28].mxu0 %vm713_vm4, %v2386_v43  ;;  %1851 = vmatmul.mubr.msk.bf16.vlgmr.msra.gmra.mrb[28].mxu1 %vm713_vm4, %v2386_v43 }
 0x239   : > { %v2482_v20 = vpop.f32.mrb[0].mxu0  ;;  %v2484_v21 = vpop.f32.mrb[0].mxu1 }
 0x23a   : > { %v2486_v22 = vpop.f32.mrb[1].mxu0  ;;  %v2488_v23 = vpop.f32.mrb[1].mxu1 }
 0x23b   : > { %v755_v25 = vpop.f32.mrb[2].mxu0  ;;  %v796_v26 = vpop.f32.mrb[2].mxu1 }
 0x23c   : > { %v756_v27 = vpop.f32.mrb[3].mxu0  ;;  %v797_v28 = vpop.f32.mrb[3].mxu1  ;;  %v1377_v26 = vlaneseq (!%p1852_p7) }
 0x23e   : > { %v1378_v27 = vand.u32 (!%p1852_p7), 127, %v1377_v26 }
 0x240   : > { %v1401_v28 = vadd.s32 (!%p1852_p7), 2944, %v1378_v27 }
 0x241   : > { %v2490_v29 = vpop.f32.mrb[4].mxu0  ;;  %v2492_v30 = vpop.f32.mrb[4].mxu1 }
 0x242   : > { %v2494_v31 = vpop.f32.mrb[5].mxu0  ;;  %v2496_v32 = vpop.f32.mrb[5].mxu1  ;;  %vm1433_vm5 = vcmp.eq.s32.totalorder (!%p1852_p7), %v1401_v28, 2985 }
 0x243   : > { %v837_v43 = vpop.f32.mrb[6].mxu0  ;;  %v878_v33 = vpop.f32.mrb[6].mxu1 }
 0x244   : > { %v838_v34 = vpop.f32.mrb[7].mxu0  ;;  %v879_v35 = vpop.f32.mrb[7].mxu1 }
 0x249   : > { %v2498_v36 = vpop.f32.mrb[8].mxu0  ;;  %v2500_v37 = vpop.f32.mrb[8].mxu1 }
 0x24a   : > { %v2502_v38 = vpop.f32.mrb[9].mxu0  ;;  %v2504_v39 = vpop.f32.mrb[9].mxu1 }
 0x24b   : > { %v919_v40 = vpop.f32.mrb[10].mxu0  ;;  %v960_v41 = vpop.f32.mrb[10].mxu1 }
 0x24c   : > { %v920_v42 = vpop.f32.mrb[11].mxu0  ;;  %v961_v44 = vpop.f32.mrb[11].mxu1 }
 0x251   : > { %v2506_v45 = vpop.f32.mrb[12].mxu0  ;;  %v2508_v46 = vpop.f32.mrb[12].mxu1 }
 0x252   : > { %v2510_v47 = vpop.f32.mrb[13].mxu0  ;;  %v2512_v48 = vpop.f32.mrb[13].mxu1 }
 0x253   : > { %v1001_v49 = vpop.f32.mrb[14].mxu0  ;;  %v1042_v50 = vpop.f32.mrb[14].mxu1 }
 0x254   : > { %v1002_v51 = vpop.f32.mrb[15].mxu0  ;;  %v1043_v52 = vpop.f32.mrb[15].mxu1 }
 0x259   : > { %v2514_v53 = vpop.f32.mrb[16].mxu0  ;;  %v2516_v54 = vpop.f32.mrb[16].mxu1 }
 0x25a   : > { %v2518_v55 = vpop.f32.mrb[17].mxu0  ;;  %v2520_v56 = vpop.f32.mrb[17].mxu1 }
 0x25b   : > { %v1083_v57 = vpop.f32.mrb[18].mxu0  ;;  %v1124_v58 = vpop.f32.mrb[18].mxu1 }
 0x25c   : > { %v1084_v59 = vpop.f32.mrb[19].mxu0  ;;  %v1125_v60 = vpop.f32.mrb[19].mxu1 }
 0x261   : > { %v2522_v61 = vpop.f32.mrb[20].mxu0  ;;  %v2524_v62 = vpop.f32.mrb[20].mxu1 }
 0x262   : > { %v2526_v63 = vpop.f32.mrb[21].mxu0  ;;  %v2528_v0 = vpop.f32.mrb[21].mxu1 }
 0x263   : > { %v1165_v1 = vpop.f32.mrb[22].mxu0  ;;  %v1206_v2 = vpop.f32.mrb[22].mxu1  ;;  %v1465_v43 = vsel (!%p1852_p7), %vm1433_vm5, %v2528_v0, -inf }
 0x264   : > { %v1166_v3 = vpop.f32.mrb[23].mxu0  ;;  %v1207_v4 = vpop.f32.mrb[23].mxu1  ;;  %1505 = vmax.xlane.f32.xlu0 (!%p1852_p7), %v1465_v43 }
 0x269   : > { %v2530_v5 = vpop.f32.mrb[24].mxu0  ;;  %v2532_v6 = vpop.f32.mrb[24].mxu1 }
 0x26a   : > { %v2534_v7 = vpop.f32.mrb[25].mxu0  ;;  %v2536_v8 = vpop.f32.mrb[25].mxu1 }
 0x26b   : > { %v1247_v9 = vpop.f32.mrb[26].mxu0  ;;  %v1288_v10 = vpop.f32.mrb[26].mxu1 }
 0x26c   : > { %v1248_v11 = vpop.f32.mrb[27].mxu0  ;;  %v1289_v12 = vpop.f32.mrb[27].mxu1 }
 0x26e   : > { %1376 = sbr.rel (%p1852_p7) target bundleno = 755 (0x2f3), region = 56 }
 0x271   : > { %v2538_v13 = vpop.f32.mrb[28].mxu0  ;;  %v2540_v14 = vpop.f32.mrb[28].mxu1 }
 0x272   : > { %v2542_v15 = vpop.f32.mrb[29].mxu0  ;;  %v2544_v16 = vpop.f32.mrb[29].mxu1 }
 0x273   : > { %v1329_v17 = vpop.f32.mrb[30].mxu0  ;;  %v1370_v18 = vpop.f32.mrb[30].mxu1 }
 0x274   : > { %v1330_v19 = vpop.f32.mrb[31].mxu0  ;;  %v1371_v25 = vpop.f32.mrb[31].mxu1 }
 0x2f1   : > { %v1506_v33 = vpop.xlane.xlu0 %1505 }
 0x2f2   : > { %1508 = vst.msk [vmem:[#allocation5] sm:$0xff] %vm1507_vm6, %v1506_v33 }
 0x2f3 PF: > { %v1510_v34 = vmax.f32 %v2482_v20, %v2490_v29  ;;  %v1511_v35 = vmax.f32 %v2486_v22, %v2494_v31  ;;  %v1512_v40 = vmax.f32 %v2484_v21, %v2492_v30  ;;  %v1513_v41 = vmax.f32 %v2488_v23, %v2496_v32  ;;  %1950 = vset.pattern.permute.xlu0 %v2162_v24  ;;  %v2583_v33 = vld [vmem:[#allocation3] sm:$0xff] }
 0x2f4   : > { %vm1684_vm7 = vcmask 7168  }
 0x2f5   : > { %v1514_v42 = vmax.f32 %v1510_v34, %v2498_v36  ;;  %v1515_v44 = vmax.f32 %v1511_v35, %v2502_v38  ;;  %v1516_v49 = vmax.f32 %v1512_v40, %v2500_v37  ;;  %v1517_v50 = vmax.f32 %v1513_v41, %v2504_v39 }
 0x2f7   : > { %v1518_v51 = vmax.f32 %v1514_v42, %v2506_v45  ;;  %v1519_v52 = vmax.f32 %v1515_v44, %v2510_v47  ;;  %v1520_v57 = vmax.f32 %v1516_v49, %v2508_v46  ;;  %v1521_v58 = vmax.f32 %v1517_v50, %v2512_v48 }
 0x2f9   : > { %v1522_v59 = vmax.f32 %v1518_v51, %v2514_v53  ;;  %v1523_v24 = vmax.f32 %v1519_v52, %v2518_v55  ;;  %v1524_v60 = vmax.f32 %v1520_v57, %v2516_v54  ;;  %v1525_v1 = vmax.f32 %v1521_v58, %v2520_v56 }
 0x2fb   : > { %v1526_v2 = vmax.f32 %v1522_v59, %v2522_v61  ;;  %v1527_v3 = vmax.f32 %v1523_v24, %v2526_v63  ;;  %v1528_v4 = vmax.f32 %v1524_v60, %v2524_v62  ;;  %v1529_v9 = vmax.f32 %v1525_v1, %v2528_v0 }
 0x2fd   : > { %v1530_v10 = vmax.f32 %v1526_v2, %v2530_v5  ;;  %v1531_v11 = vmax.f32 %v1527_v3, %v2534_v7  ;;  %v1532_v12 = vmax.f32 %v1528_v4, %v2532_v6  ;;  %v1533_v17 = vmax.f32 %v1529_v9, %v2536_v8 }
 0x2ff   : > { %v1534_v18 = vmax.f32 %v1530_v10, %v2538_v13  ;;  %v1535_v19 = vmax.f32 %v1531_v11, %v2542_v15  ;;  %v1536_v25 = vmax.f32 %v1532_v12, %v2540_v14  ;;  %v1537_v26 = vmax.f32 %v1533_v17, %v2544_v16 }
 0x301   : > { %v1538_v27 = vmax.f32 %v1534_v18, %v1535_v19  ;;  %v1539_v28 = vmax.f32 %v1536_v25, %v1537_v26 }
 0x303   : > { %v1540_v43 = vmax.f32 %v1538_v27, %v1539_v28 }
 0x305   : > { %1541 = vmax.xlane.f32.xlu0 %v1540_v43 }
 0x392   : > { %v1542_v34 = vpop.xlane.xlu0 %1541 }
 0x393   : > { %v2586_v35 = vmax.f32 %v2583_v33, %v1542_v34 }
 0x395   : > { %v1544_v40 = vsub.f32 %v2583_v33, %v2586_v35  ;;  %1686 = vst.msk [vmem:[#allocation3] sm:$0xff] %vm1684_vm7, %v2586_v35  ;;  %1551 = vperm.xlu0 %1950, %v2586_v35  }
 0x414   : > { %v2593_v41 = vpop.permute.xlu0 %1551 }
 0x415   : > { %v1554_v42 = vsub.f32 %v2482_v20, %v2593_v41  ;;  %v1555_v44 = vsub.f32 %v2486_v22, %v2593_v41  ;;  %v1556_v49 = vsub.f32 %v2484_v21, %v2593_v41  ;;  %v1557_v50 = vsub.f32 %v2488_v23, %v2593_v41 }
 0x416   : > { %v1558_v57 = vsub.f32 %v2490_v29, %v2593_v41  ;;  %v1559_v59 = vsub.f32 %v2494_v31, %v2593_v41  ;;  %v1560_v22 = vsub.f32 %v2492_v30, %v2593_v41  ;;  %v1561_v23 = vsub.f32 %v2496_v32, %v2593_v41 }
 0x417   : > { %v1586_v51 = vmul.f32 1.442695, %v1554_v42  ;;  %v1588_v52 = vmul.f32 1.442695, %v1555_v44  ;;  %v1590_v58 = vmul.f32 1.442695, %v1556_v49  ;;  %v1562_v29 = vsub.f32 %v2498_v36, %v2593_v41 }
 0x418   : > { %v1592_v20 = vmul.f32 1.442695, %v1557_v50  ;;  %v1594_v21 = vmul.f32 1.442695, %v1558_v57  ;;  %v1596_v24 = vmul.f32 1.442695, %v1559_v59  ;;  %v1563_v31 = vsub.f32 %v2502_v38, %v2593_v41 }
 0x419   : > { %1951 = vpow2.f32 %v1586_v51  ;;  %v1598_v60 = vmul.f32 1.442695, %v1560_v22  ;;  %v1600_v1 = vmul.f32 1.442695, %v1561_v23  ;;  %v1564_v30 = vsub.f32 %v2500_v37, %v2593_v41 }
 0x41a   : > { %1953 = vpow2.f32 %v1588_v52  ;;  %v1602_v4 = vmul.f32 1.442695, %v1562_v29  ;;  %v1565_v10 = vsub.f32 %v2504_v39, %v2593_v41  ;;  %v1604_v36 = vmul.f32 1.442695, %v1563_v31 }
 0x41b   : > { %1955 = vpow2.f32 %v1590_v58  ;;  %v1566_v38 = vsub.f32 %v2506_v45, %v2593_v41  ;;  %v1606_v17 = vmul.f32 1.442695, %v1564_v30  ;;  %v1567_v37 = vsub.f32 %v2510_v47, %v2593_v41 }
 0x41c   : > { %1957 = vpow2.f32 %v1592_v20  ;;  %v1608_v25 = vmul.f32 1.442695, %v1565_v10  ;;  %v1568_v39 = vsub.f32 %v2508_v46, %v2593_v41  ;;  %v1569_v45 = vsub.f32 %v2512_v48, %v2593_v41 }
 0x41d   : > { %1959 = vpow2.f32 %v1594_v21  ;;  %v1610_v28 = vmul.f32 1.442695, %v1566_v38  ;;  %v1612_v42 = vmul.f32 1.442695, %v1567_v37  ;;  %v1570_v47 = vsub.f32 %v2514_v53, %v2593_v41 }
 0x41e   : > { %1961 = vpow2.f32 %v1596_v24  ;;  %v1614_v50 = vmul.f32 1.442695, %v1568_v39  ;;  %v1571_v46 = vsub.f32 %v2518_v55, %v2593_v41  ;;  %v1616_v57 = vmul.f32 1.442695, %v1569_v45 }
 0x41f   : > { %1963 = vpow2.f32 %v1598_v60  ;;  %v1572_v48 = vsub.f32 %v2516_v54, %v2593_v41  ;;  %v1618_v20 = vmul.f32 1.442695, %v1570_v47  ;;  %v1573_v53 = vsub.f32 %v2520_v56, %v2593_v41 }
 0x420   : > { %1965 = vpow2.f32 %v1600_v1  ;;  %v1620_v23 = vmul.f32 1.442695, %v1571_v46  ;;  %v1574_v55 = vsub.f32 %v2522_v61, %v2593_v41  ;;  %v1575_v54 = vsub.f32 %v2526_v63, %v2593_v41 }
 0x421   : > { %1967 = vpow2.f32 %v1602_v4  ;;  %v1622_v60 = vmul.f32 1.442695, %v1572_v48  ;;  %v1576_v56 = vsub.f32 %v2524_v62, %v2593_v41  ;;  %v1577_v61 = vsub.f32 %v2528_v0, %v2593_v41 }
 0x422   : > { %1969 = vpow2.f32 %v1604_v36  ;;  %v1626_v4 = vmul.f32 1.442695, %v1574_v55  ;;  %v1628_v10 = vmul.f32 1.442695, %v1575_v54  ;;  %v1578_v63 = vsub.f32 %v2530_v5, %v2593_v41 }
 0x423   : > { %v1952_v2 = vpop.eup %1951  ;;  %1971 = vpow2.f32 %v1606_v17  ;;  %v1579_v62 = vsub.f32 %v2534_v7, %v2593_v41  ;;  %v1580_v0 = vsub.f32 %v2532_v6, %v2593_v41  ;;  %v1581_v5 = vsub.f32 %v2536_v8, %v2593_v41 }
 0x424   : > { %v1954_v3 = vpop.eup %1953  ;;  %1973 = vpow2.f32 %v1608_v25  ;;  %v1634_v25 = vmul.f32 1.442695, %v1578_v63  ;;  %v1582_v7 = vsub.f32 %v2538_v13, %v2593_v41  ;;  %v1583_v6 = vsub.f32 %v2542_v15, %v2593_v41 }
 0x425   : > { %v1650_v32 = vadd.f32 %v1954_v3, %v1952_v2  ;;  %v1956_v9 = vpop.eup %1955  ;;  %1975 = vpow2.f32 %v1610_v28  ;;  %v1624_v2 = vmul.f32 1.442695, %v1573_v53  ;;  %v1636_v39 = vmul.f32 1.442695, %v1579_v62 }
 0x426   : > { %v1958_v12 = vpop.eup %1957  ;;  %1977 = vpow2.f32 %v1612_v42  ;;  %v1584_v8 = vsub.f32 %v2540_v14, %v2593_v41  ;;  %v1585_v13 = vsub.f32 %v2544_v16, %v2593_v41  ;;  %v1644_v46 = vmul.f32 1.442695, %v1583_v6 }
 0x427   : > { %v1651_v11 = vadd.f32 %v1956_v9, %v1650_v32  ;;  %v1960_v19 = vpop.eup %1959  ;;  %1979 = vpow2.f32 %v1614_v50  ;;  %v1642_v50 = vmul.f32 1.442695, %v1582_v7 }
 0x428   : > { %v1962_v27 = vpop.eup %1961  ;;  %1981 = vpow2.f32 %v1616_v57  ;;  %v1646_v15 = vmul.f32 1.442695, %v1584_v8 }
 0x429   : > { %v1652_v18 = vadd.f32 %v1958_v12, %v1651_v11  ;;  %v1964_v34 = vpop.eup %1963  ;;  %1983 = vpow2.f32 %v1618_v20  ;;  %v1630_v12 = vmul.f32 1.442695, %v1576_v56  ;;  %v1648_v20 = vmul.f32 1.442695, %v1585_v13  ;;  %v1547_v56 = vld [vmem:[#allocation4] sm:$0xff] }
 0x42a   : > { %v1966_v49 = vpop.eup %1965  ;;  %1985 = vpow2.f32 %v1620_v23 }
 0x42b   : > { %v1653_v26 = vadd.f32 %v1960_v19, %v1652_v18  ;;  %v1968_v52 = vpop.eup %1967  ;;  %1987 = vpow2.f32 %v1622_v60  ;;  %v1632_v18 = vmul.f32 1.442695, %v1577_v61  ;;  %v1690_v61 = vld [vmem:[#allocation5] sm:$0xff] (!%p1852_p7) }
 0x42c   : > { %v1970_v59 = vpop.eup %1969  ;;  %1989 = vpow2.f32 %v1624_v2 }
 0x42d   : > { %v1654_v43 = vadd.f32 %v1962_v27, %v1653_v26  ;;  %v1972_v21 = vpop.eup %1971  ;;  %1991 = vpow2.f32 %v1626_v4 }
 0x42e   : > { %v1974_v29 = vpop.eup %1973  ;;  %1993 = vpow2.f32 %v1628_v10  ;;  %v1691_v10 = vld [vmem:[#allocation3] sm:$0xff] (!%p1852_p7) }
 0x42f   : > { %v1655_v44 = vadd.f32 %v1964_v34, %v1654_v43  ;;  %v1976_v1 = vpop.eup %1975  ;;  %1995 = vpow2.f32 %v1630_v12  ;;  %v1638_v34 = vmul.f32 1.442695, %v1580_v0 }
 0x430   : > { %v1978_v30 = vpop.eup %1977  ;;  %1997 = vpow2.f32 %v1632_v18 }
 0x431   : > { %v1656_v51 = vadd.f32 %v1966_v49, %v1655_v44  ;;  %v1980_v9 = vpop.eup %1979  ;;  %1999 = vpow2.f32 %v1634_v25  ;;  %v1640_v44 = vmul.f32 1.442695, %v1581_v5 }
 0x432   : > { %v1982_v11 = vpop.eup %1981  ;;  %2001 = vpow2.f32 %v1636_v39 }
 0x433   : > { %v1657_v58 = vadd.f32 %v1968_v52, %v1656_v51  ;;  %v1984_v17 = vpop.eup %1983  ;;  %2003 = vpow2.f32 %v1638_v34 }
 0x434   : > { %v1986_v37 = vpop.eup %1985  ;;  %2005 = vpow2.f32 %v1640_v44 }
 0x435   : > { %v1658_v22 = vadd.f32 %v1970_v59, %v1657_v58  ;;  %v1988_v27 = vpop.eup %1987  ;;  %2007 = vpow2.f32 %v1642_v50 }
 0x436   : > { %v1990_v43 = vpop.eup %1989  ;;  %2009 = vpow2.f32 %v1644_v46 }
 0x437   : > { %v1659_v24 = vadd.f32 %v1972_v21, %v1658_v22  ;;  %v1992_v42 = vpop.eup %1991  ;;  %2011 = vpow2.f32 %v1646_v15 }
 0x438   : > { %v1994_v47 = vpop.eup %1993  ;;  %2013 = vpow2.f32 %v1648_v20 }
 0x439   : > { %v1660_v31 = vadd.f32 %v1974_v29, %v1659_v24  ;;  %v1996_v52 = vpop.eup %1995 }
 0x43a   : > { %v1998_v58 = vpop.eup %1997 }
 0x43b   : > { %v1661_v3 = vadd.f32 %v1976_v1, %v1660_v31  ;;  %v2000_v48 = vpop.eup %1999 }
 0x43c   : > { %v2002_v21 = vpop.eup %2001 }
 0x43d   : > { %v1662_v32 = vadd.f32 %v1978_v30, %v1661_v3  ;;  %v2004_v53 = vpop.eup %2003  ;;  %v1545_v3 = vmul.f32 1.442695, %v1544_v40 }
 0x43e   : > { %v2006_v24 = vpop.eup %2005 }
 0x43f   : > { %v1663_v36 = vadd.f32 %v1980_v9, %v1662_v32  ;;  %v2008_v16 = vpop.eup %2007  ;;  %2015 = vpow2.f32 %v1545_v3 }
 0x440   : > { %v2010_v55 = vpop.eup %2009 }
 0x441   : > { %v1664_v38 = vadd.f32 %v1982_v11, %v1663_v36  ;;  %v2012_v31 = vpop.eup %2011  ;;  %v1692_v11 = vsub.f32 (!%p1852_p7), %v1690_v61, %v1691_v10 }
 0x442   : > { %v2014_v54 = vpop.eup %2013 }
 0x443   : > { %v1665_v19 = vadd.f32 %v1984_v17, %v1664_v38  ;;  %v1693_v63 = vmul.f32 (!%p1852_p7), 1.442695, %v1692_v11 }
 0x445   : > { %v1666_v26 = vadd.f32 %v1986_v37, %v1665_v19 }
 0x447   : > { %v1667_v28 = vadd.f32 %v1988_v27, %v1666_v26 }
 0x449   : > { %v1668_v45 = vadd.f32 %v1990_v43, %v1667_v28  ;;  %v2016_v30 = vpop.eup %2015 }
 0x44a   : > { %v1548_v4 = vmul.f32 %v2016_v30, %v1547_v56 }
 0x44b   : > { %v1669_v49 = vadd.f32 %v1992_v42, %v1668_v45 }
 0x44d   : > { %v1670_v51 = vadd.f32 %v1994_v47, %v1669_v49 }
 0x44f   : > { %v1671_v57 = vadd.f32 %v1996_v52, %v1670_v51 }
 0x451   : > { %v1672_v59 = vadd.f32 %v1998_v58, %v1671_v57 }
 0x453   : > { %v1673_v22 = vadd.f32 %v2000_v48, %v1672_v59 }
 0x455   : > { %v1674_v14 = vadd.f32 %v2002_v21, %v1673_v22 }
 0x457   : > { %v1675_v23 = vadd.f32 %v2004_v53, %v1674_v14 }
 0x459   : > { %v1676_v29 = vadd.f32 %v2006_v24, %v1675_v23 }
 0x45b   : > { %v1677_v41 = vadd.f32 %v2008_v16, %v1676_v29 }
 0x45d   : > { %v1678_v60 = vadd.f32 %v2010_v55, %v1677_v41 }
 0x45f   : > { %v1679_v1 = vadd.f32 %v2012_v31, %v1678_v60 }
 0x461   : > { %v1680_v2 = vadd.f32 %v2014_v54, %v1679_v1 }
 0x463   : > { %1681 = vadd.xlane.f32.xlu1 %v1680_v2 }
 0x4ed   : > { %1689 = sbr.rel (%p1852_p7) target bundleno = 1290 (0x50a), region = 60 }
 0x4f0   : > { %v1682_v32 = vpop.xlane.xlu1 %1681 }
 0x4f1   : > { %v1683_v9 = vadd.f32 %v1682_v32, %v1548_v4 }
 0x4f3   : > { %1685 = vst.msk [vmem:[#allocation4] sm:$0xff] %vm1684_vm7, %v1683_v9 }
 0x4fa   : > { %v1695_v36 = vld [vmem:[#allocation4] sm:$0xff] }
 0x4fb   : > { %2017 = vrcp.f32 %v1695_v36 }
 0x4fc   : > { %2019 = vpow2.f32 %v1693_v63 }
 0x505   : > { %v2018_v33 = vpop.eup %2017 }
 0x506   : > { %v2020_v35 = vpop.eup %2019 }
 0x507   : > { %v1697_v40 = vmul.f32 %v2020_v35, %v2018_v33 }
 0x509   : > { %1698 = vst.msk [vmem:[%s2686_s4] sm:$0xff] %vm1684_vm7, %v1697_v40 }
 0x50a PF: > { %p13_p11 = scmp.ge.s32.totalorder %s2210_s20, 4   ;;  %s2704_s15 = smov %s2141_s16 }
 0x50b   : > { %s2705_s16 = smov %s2145_s17  ;;  %s2706_s17 = smov %s2220_s23 }
 0x50c   : > { %s2707_s18 = smov %s2210_s20  ;;  %15 = sbr.rel (!%p13_p11) target bundleno = 3 (0x3), region = 91 }
 0x513   :  { %1710 = vsyncpa [#allocation7], 1 }
 0x514   :  { %1712 = vsyncpa [#allocation7 + $0x1], 1 }
 0x515   :  { %1713 = vsyncpa [#allocation9], 1 }

</bundles_post_ra>
